<compile_context>
chip_gen: v7x
topology: tpu7x:2x2x1
jax: 0.10.0
libtpu: 0.0.40
codegen_flags: <defaults>
</compile_context>

<pallas_src>
import functools

import jax
import jax.numpy as jnp
from jax.experimental import pallas as pl
from jax.experimental.pallas import tpu as pltpu


# --------------------------- hardware-aware sizing ---------------------------

def _tpu_vmem_capacity_bytes():
    try:
        info = pltpu.get_tpu_info()
    except Exception:
        return None
    for attr in ("vmem_capacity_bytes", "vmem_bytes", "vmem_size_bytes"):
        v = getattr(info, attr, None)
        if v:
            try:
                return int(v)
            except (TypeError, ValueError):
                continue
    return None


def _vmem_plan():
    """Return (target_block_bytes, vmem_limit_bytes) for the current TPU gen."""
    phys = _tpu_vmem_capacity_bytes()
    if phys is None:
        phys = 64 << 20                       # conservative: v7x physical VMEM
    # v5e/v6e: 128 MiB physical -> ~6 MiB streaming blocks; v7x: 64 MiB -> 4 MiB.
    target = (6 << 20) if phys >= (96 << 20) else (4 << 20)
    # Budget: double-buffered input block + weights + (C, chunk_w) scratch + headroom.
    limit = min(phys * 3 // 4, 2 * target + (32 << 20))
    limit = max(limit, 32 << 20)
    return target, int(limit)


def _pick_hw_tile(hw, c, itemsize, target_block_bytes):
    """Largest 128-multiple lane tile keeping a double-buffered block in budget."""
    max_lanes = max(128, target_block_bytes // max(1, c * itemsize))
    max_lanes = max(128, (max_lanes // 128) * 128)
    if hw <= max_lanes:
        return hw                              # one block covers the whole row
    t = max_lanes
    while t >= 128:
        if hw % t == 0:                        # exact divisor: no ragged tail
            return t
        t -= 128
    return max_lanes                           # ragged tail masked on last step


def _pick_b_tile(batch, per_batch_bytes, target_block_bytes):
    """Divisor of `batch` that is the full batch or a multiple of 8 (keeps the
    (b_tile, C) output block sublane-aligned), sized near the block target."""
    cands = [d for d in range(1, batch + 1)
             if batch % d == 0 and (d == batch or d % 8 == 0)]
    fitting = [d for d in cands if d * per_batch_bytes <= target_block_bytes]
    return max(fitting) if fitting else min(cands)


# --------------------- fast path: small H*W, batch-tiled ---------------------

def _fused_small_kernel(x_ref, w1t_ref, w2t_ref, o_ref, *, hw):
    # x: (b_tile, C, HW); w1t: (C, Cr); w2t: (Cr, C); o: (b_tile, C)
    xb = x_ref[...]
    b_tile = xb.shape[0]
    maxp = jnp.max(xb, axis=-1).astype(jnp.float32)                 # (b_tile, C)
    avgp = jnp.sum(xb.astype(jnp.float32), axis=-1) * (1.0 / hw)    # (b_tile, C)

    # Stack the two pooled stats so each SE weight is multiplied exactly once.
    stats = jnp.concatenate([maxp, avgp], axis=0)                   # (2*b_tile, C)
    h = jnp.maximum(
        jnp.dot(stats, w1t_ref[...], preferred_element_type=jnp.float32), 0.0)
    se = jnp.dot(h, w2t_ref[...], preferred_element_type=jnp.float32)

    gate = jax.nn.sigmoid(se[:b_tile] + se[b_tile:])                # (b_tile, C)
    o_ref[...] = gate.astype(o_ref.dtype)


# ------------------- streaming path: large H*W, spatial grid -----------------

def _stream_kernel(x_ref, w1_ref, w2_ref, o_ref, max_acc, sum_acc,
                   *, hw, hw_tile, chunk_w, needs_mask):
    # x: (1, C, hw_tile); w1: (Cr, C); w2: (C, Cr); o: (1, C, 1)
    # max_acc / sum_acc: (C, chunk_w) lane-dense f32 partials.
    k = pl.program_id(1)
    n_k = pl.num_programs(1)
    n_chunks = hw_tile // chunk_w

    @pl.when(k == 0)
    def _init():
        max_acc[...] = jnp.full(max_acc.shape, -jnp.inf, dtype=max_acc.dtype)
        sum_acc[...] = jnp.zeros(sum_acc.shape, dtype=sum_acc.dtype)

    def _update(valid):
        # `valid` is a trace-time Python int: number of valid lanes in this block.
        mx = max_acc[...]
        sm = sum_acc[...]
        for c in range(n_chunks):
            lo = c * chunk_w
            if lo >= valid:                    # wholly-padded chunk: skip
                break
            chunk = x_ref[0, :, pl.ds(lo, chunk_w)].astype(jnp.float32)
            if lo + chunk_w > valid:           # partially valid tail chunk
                keep = (jax.lax.broadcasted_iota(jnp.int32, (1, chunk_w), 1)
                        < (valid - lo))
                c_max = jnp.where(keep, chunk, -jnp.inf)
                c_sum = jnp.where(keep, chunk, 0.0)
            else:                              # full chunk: no mask, pure VPU
                c_max = chunk
                c_sum = chunk
            mx = jnp.maximum(mx, c_max)
            sm = sm + c_sum
        max_acc[...] = mx
        sum_acc[...] = sm

    if needs_mask:
        # Pay the mask only on the last spatial step.
        @pl.when(k < n_k - 1)
        def _body():
            _update(hw_tile)

        @pl.when(k == n_k - 1)
        def _tail():
            _update(hw % hw_tile)
    else:
        _update(hw_tile)

    @pl.when(k == n_k - 1)
    def _finalize():
        # Single cross-lane reduce per batch, then the tiny fused SE MLP.
        maxp = jnp.max(max_acc[...], axis=1, keepdims=True)                 # (C, 1)
        avgp = jnp.sum(sum_acc[...], axis=1, keepdims=True) * (1.0 / hw)    # (C, 1)
        stats = jnp.concatenate([maxp, avgp], axis=1)                       # (C, 2)

        h = jnp.maximum(
            jnp.dot(w1_ref[...], stats, preferred_element_type=jnp.float32), 0.0)
        se = jnp.dot(w2_ref[...], h, preferred_element_type=jnp.float32)    # (C, 2)

        gate = jax.nn.sigmoid(se[:, 0:1] + se[:, 1:2])                      # (C, 1)
        o_ref[0] = gate.astype(o_ref.dtype)


# ----------------------------------- wrapper ---------------------------------

def channel_attention(x, w1, w2, *, hw_tile=None):
    """x: (B, C, H, W); w1: (C//r, C); w2: (C, C//r).  Returns gate (B, C, 1, 1)."""
    B, C, H, W = x.shape
    HW = H * W
    Cr = w1.shape[0]
    assert w1.shape == (Cr, C) and w2.shape == (C, Cr), (w1.shape, w2.shape)
    assert jnp.issubdtype(x.dtype, jnp.floating), \
        "float input required (-inf masking sentinel)"

    target_block_bytes, vmem_limit = _vmem_plan()
    itemsize = jnp.dtype(x.dtype).itemsize
    x_flat = x.reshape(B, C, HW)               # free reshape of NCHW

    w_bytes = jnp.dtype(w1.dtype).itemsize
    cost = pl.CostEstimate(
        flops=int(2 * B * C * HW + 8 * B * C * Cr),
        transcendentals=int(B * C),
        bytes_accessed=int(B * C * HW * itemsize + 2 * C * Cr * w_bytes
                           + B * C * itemsize),
    )

    per_batch_bytes = C * HW * itemsize
    use_fast_path = hw_tile is None and per_batch_bytes <= (2 << 20)

    if use_fast_path:
        b_tile = _pick_b_tile(B, per_batch_bytes, target_block_bytes)
        gate = pl.pallas_call(
            functools.partial(_fused_small_kernel, hw=HW),
            out_shape=jax.ShapeDtypeStruct((B, C), x.dtype),
            grid_spec=pltpu.PrefetchScalarGridSpec(
                num_scalar_prefetch=0,
                grid=(B // b_tile,),
                in_specs=[
                    pl.BlockSpec((b_tile, C, HW), lambda i: (i, 0, 0)),
                    pl.BlockSpec((C, Cr), lambda i: (0, 0)),      # w1.T resident
                    pl.BlockSpec((Cr, C), lambda i: (0, 0)),      # w2.T resident
                ],
                out_specs=pl.BlockSpec((b_tile, C), lambda i: (i, 0)),
            ),
            compiler_params=pltpu.CompilerParams(
                dimension_semantics=("parallel",),
                vmem_limit_bytes=vmem_limit),
            cost_estimate=cost,
        )(x_flat, w1.T, w2.T)
        return gate.reshape(B, C, 1, 1)

    # Streaming path: spatial axis tiled into the last ("arbitrary") grid dim.
    if hw_tile is None:
        hw_tile = _pick_hw_tile(HW, C, itemsize, target_block_bytes)
    else:
        hw_tile = max(128, (int(hw_tile) // 128) * 128)           # lane-safe
        if hw_tile >= HW:
            hw_tile = HW
    n_k = pl.cdiv(HW, hw_tile)
    needs_mask = (HW % hw_tile) != 0

    if hw_tile % 512 == 0:
        chunk_w = 512
    elif hw_tile % 256 == 0:
        chunk_w = 256
    elif hw_tile % 128 == 0:
        chunk_w = 128
    else:
        chunk_w = hw_tile                      # single full-extent chunk

    stream = functools.partial(_stream_kernel, hw=HW, hw_tile=hw_tile,
                               chunk_w=chunk_w, needs_mask=needs_mask)

    gate = pl.pallas_call(
        stream,
        out_shape=jax.ShapeDtypeStruct((B, C, 1), x.dtype),
        grid_spec=pltpu.PrefetchScalarGridSpec(
            num_scalar_prefetch=0,
            grid=(B, n_k),
            in_specs=[
                pl.BlockSpec((1, C, hw_tile), lambda b, k: (b, 0, k)),
                pl.BlockSpec((Cr, C), lambda b, k: (0, 0)),       # w1 resident
                pl.BlockSpec((C, Cr), lambda b, k: (0, 0)),       # w2 resident
            ],
            out_specs=pl.BlockSpec((1, C, 1), lambda b, k: (b, 0, 0)),
            scratch_shapes=[pltpu.VMEM((C, chunk_w), jnp.float32),
                            pltpu.VMEM((C, chunk_w), jnp.float32)],
        ),
        compiler_params=pltpu.CompilerParams(
            dimension_semantics=("parallel", "arbitrary"),
            vmem_limit_bytes=vmem_limit),
        cost_estimate=cost,
    )(x_flat, w1, w2)
    return gate.reshape(B, C, 1, 1)


def channel_attention_ref(x, w1, w2):
    """Pure-JAX reference matching the PyTorch forward."""
    max_r = jnp.max(x, axis=(2, 3))      # (B, C)
    avg_r = jnp.mean(x, axis=(2, 3))     # (B, C)

    def se(v):
        return jnp.maximum(v @ w1.T, 0.0) @ w2.T

    return jax.nn.sigmoid(se(max_r) + se(avg_r))[:, :, None, None]


if __name__ == "__main__":
    key = jax.random.PRNGKey(0)
    kx, k1, k2, kx2, k3, k4 = jax.random.split(key, 6)

    # Case 1: C=64, reduction=16, 16x16 spatial -> fused small-H*W fast path.
    B, C, H, W = 2, 64, 16, 16
    Cr = C // 16
    x = jax.random.normal(kx, (B, C, H, W), dtype=jnp.float32)
    w1 = jax.random.normal(k1, (Cr, C), dtype=jnp.float32) * (2.0 / C) ** 0.5
    w2 = jax.random.normal(k2, (C, Cr), dtype=jnp.float32) * (2.0 / Cr) ** 0.5

    out = jax.block_until_ready(channel_attention(x, w1, w2))
    ref = channel_attention_ref(x, w1, w2)
    assert out.shape == (B, C, 1, 1), out.shape
    assert jnp.allclose(out, ref, atol=2e-5, rtol=2e-5), \
        float(jnp.max(jnp.abs(out - ref)))

    # Case 1b: same data forced through the streaming path (HW=256, tile=128,
    # exact divisor -> 2 unmasked accumulator steps per batch).
    out1b = jax.block_until_ready(channel_attention(x, w1, w2, hw_tile=128))
    assert jnp.allclose(out1b, ref, atol=2e-5, rtol=2e-5), \
        float(jnp.max(jnp.abs(out1b - ref)))

    # Case 2: ragged spatial tail (HW=400 tiled at 128 -> 4 steps, 16-lane
    # mask applied only on the last step).
    B2, C2, H2, W2 = 2, 32, 20, 20
    Cr2 = C2 // 8
    x2 = jax.random.normal(kx2, (B2, C2, H2, W2), dtype=jnp.float32)
    w1b = jax.random.normal(k3, (Cr2, C2), dtype=jnp.float32) * (2.0 / C2) ** 0.5
    w2b = jax.random.normal(k4, (C2, Cr2), dtype=jnp.float32) * (2.0 / Cr2) ** 0.5

    out2 = jax.block_until_ready(channel_attention(x2, w1b, w2b, hw_tile=128))
    ref2 = channel_attention_ref(x2, w1b, w2b)
    assert jnp.allclose(out2, ref2, atol=2e-5, rtol=2e-5), \
        float(jnp.max(jnp.abs(out2 - ref2)))

    print("KERNEL_OK")
</pallas_src>

<mosaic_0001>
module attributes {stable_mosaic.version = 11 : i64} {
  func.func @_fused_small_kernel(%arg0: i32, %arg1: memref<2x64x256xf32, #tpu.memory_space<vmem>>, %arg2: memref<64x4xf32, #tpu.memory_space<vmem>>, %arg3: memref<4x64xf32, #tpu.memory_space<vmem>>, %arg4: memref<2x64xf32, #tpu.memory_space<vmem>>) attributes {dimension_semantics = [#tpu.dimension_semantics<parallel>], iteration_bounds = array<i64: 1>, scalar_prefetch = 0 : i64, scratch_operands = 0 : i64, tpu.core_type = #tpu.core_type<tc>, window_params = [{transform_indices = @transform_0, window_bounds = array<i64: 2, 64, 256>}, {pipeline_mode = #tpu.pipeline_mode<synchronous>, transform_indices = @transform_1, window_bounds = array<i64: 64, 4>}, {pipeline_mode = #tpu.pipeline_mode<synchronous>, transform_indices = @transform_2, window_bounds = array<i64: 4, 64>}, {transform_indices = @transform_3, window_bounds = array<i64: 2, 64>}]} {
    %c0 = arith.constant 0 : index
    %c0_0 = arith.constant 0 : index
    %c0_1 = arith.constant 0 : index
    %0 = vector.load %arg1[%c0, %c0_0, %c0_1] : memref<2x64x256xf32, #tpu.memory_space<vmem>>, vector<2x64x256xf32>
    %cst = arith.constant dense<0xFF800000> : vector<2x64xf32>
    %1 = vector.multi_reduction <maximumf>, %0, %cst [2] : vector<2x64x256xf32> to vector<2x64xf32>
    %cst_2 = arith.constant dense<0.000000e+00> : vector<2x64xf32>
    %2 = vector.multi_reduction <add>, %0, %cst_2 [2] : vector<2x64x256xf32> to vector<2x64xf32>
    %cst_3 = arith.constant 3.906250e-03 : f32
    %3 = vector.broadcast %cst_3 : f32 to vector<2x64xf32>
    %4 = arith.mulf %2, %3 : vector<2x64xf32>
    %5 = tpu.concatenate %1, %4 in 0 : vector<2x64xf32>, vector<2x64xf32> -> vector<4x64xf32>
    %c0_4 = arith.constant 0 : index
    %c0_5 = arith.constant 0 : index
    %6 = vector.load %arg2[%c0_4, %c0_5] : memref<64x4xf32, #tpu.memory_space<vmem>>, vector<64x4xf32>
    %cst_6 = arith.constant dense<0.000000e+00> : vector<4x4xf32>
    %7 = tpu.matmul %5, %6, %cst_6 {dimension_numbers = #tpu.dot_dimension_numbers<[1], [0], [0], [1], [0, 0, 1, 1], [], []>} : vector<4x64xf32>, vector<64x4xf32>, vector<4x4xf32> -> vector<4x4xf32>
    %cst_7 = arith.constant 0.000000e+00 : f32
    %8 = vector.broadcast %cst_7 : f32 to vector<4x4xf32>
    %9 = arith.maximumf %7, %8 : vector<4x4xf32>
    %c0_8 = arith.constant 0 : index
    %c0_9 = arith.constant 0 : index
    %10 = vector.load %arg3[%c0_8, %c0_9] : memref<4x64xf32, #tpu.memory_space<vmem>>, vector<4x64xf32>
    %cst_10 = arith.constant dense<0.000000e+00> : vector<4x64xf32>
    %11 = tpu.matmul %9, %10, %cst_10 {dimension_numbers = #tpu.dot_dimension_numbers<[1], [0], [0], [1], [0, 0, 1, 1], [], []>} : vector<4x4xf32>, vector<4x64xf32>, vector<4x64xf32> -> vector<4x64xf32>
    %12 = vector.extract_strided_slice %11 {offsets = [0, 0], sizes = [2, 64], strides = [1, 1]} : vector<4x64xf32> to vector<2x64xf32>
    %13 = vector.extract_strided_slice %11 {offsets = [2, 0], sizes = [2, 64], strides = [1, 1]} : vector<4x64xf32> to vector<2x64xf32>
    %14 = arith.addf %12, %13 : vector<2x64xf32>
    %15 = arith.negf %14 : vector<2x64xf32>
    %16 = math.exp %15 : vector<2x64xf32>
    %cst_11 = arith.constant 1.000000e+00 : f32
    %17 = vector.broadcast %cst_11 : f32 to vector<2x64xf32>
    %18 = arith.addf %17, %16 : vector<2x64xf32>
    %19 = arith.divf %17, %18 : vector<2x64xf32>
    %c0_12 = arith.constant 0 : index
    %c0_13 = arith.constant 0 : index
    %20 = vector.load %arg4[%c0_12, %c0_13] : memref<2x64xf32, #tpu.memory_space<vmem>>, vector<2x64xf32>
    tpu.vector_store %arg4[%c0_12, %c0_13], %19 {strides = array<i32>} : memref<2x64xf32, #tpu.memory_space<vmem>>, vector<2x64xf32>,
    return
  }
  func.func @transform_0(%arg0: i32) -> (i32, i32, i32) {
    %c0_i32 = arith.constant 0 : i32
    %c0_i32_0 = arith.constant 0 : i32
    %c0_i32_1 = arith.constant 0 : i32
    return %arg0, %c0_i32, %c0_i32_0 : i32, i32, i32
  }
  func.func @transform_1(%arg0: i32) -> (i32, i32) {
    %c0_i32 = arith.constant 0 : i32
    %c0_i32_0 = arith.constant 0 : i32
    %c0_i32_1 = arith.constant 0 : i32
    return %c0_i32, %c0_i32_0 : i32, i32
  }
  func.func @transform_2(%arg0: i32) -> (i32, i32) {
    %c0_i32 = arith.constant 0 : i32
    %c0_i32_0 = arith.constant 0 : i32
    %c0_i32_1 = arith.constant 0 : i32
    return %c0_i32, %c0_i32_0 : i32, i32
  }
  func.func @transform_3(%arg0: i32) -> (i32, i32) {
    %c0_i32 = arith.constant 0 : i32
    %c0_i32_0 = arith.constant 0 : i32
    return %arg0, %c0_i32 : i32, i32
  }
}

</mosaic_0001>

<bundles_post_ra>
// kernel: tpu_custom_call.1
= control target key start
LH: loop header
LB: loop body
LE: loop exit
PB: predicated region body
PF: predicated region fallthrough
CT: control target
= control target key end

     0   :  { %8 = vsyncpa [#allocation3], 0  ;;  %s858_s0 = inlined_call_operand.hbm [shape: f32[2,64,256], index: 0, kind: input, shape index: {}]   ;;  %s859_s1 = inlined_call_operand.vmem [shape: f32[64,4], index: 1, kind: input, shape index: {}]   ;;  %s860_s2 = inlined_call_operand.vmem [shape: f32[4,64], index: 2, kind: input, shape index: {}]   ;;  %s861_s3 = inlined_call_operand.hbm [shape: f32[2,64], index: 3, kind: output, shape index: {}]  }
   0x1   :  { %9 = vsyncpa [#allocation4], 0  ;;  %s684_s12 = smov [#allocation2]   ;;  %s636_s16 = scalar_lea.hbm %s858_s0, 4096 }
   0x2   :  { %s15_s13 = sshll.u32 %s684_s12, 4  ;;  %p637_p0 = scmp.ne.s32.totalorder %s858_s0, %s636_s16  ;;  %s16_s13 = int_to_ptr.vmem [resolvable:$true] %s15_s13 }
   0x3   :  { %p640_p1 = scmp.lt.u32.totalorder %s636_s16, %s858_s0 }
   0x5   :  { %p642_p2 = pnand %p640_p1, %p637_p0 }
   0x7   :  { %645 = shalt.err (!%p642_p2)
}
   0x8   :  { %s646_s21 = scalar_lea.vmem %s16_s13, 4096  ;;  %p651_p4 = scmp.lt.s32.totalorder %s16_s13, %s16_s13 }
   0x9   :  { %p647_p3 = scmp.ne.s32.totalorder %s16_s13, %s646_s21  ;;  %p652_p5 = scmp.lt.s32.totalorder %s646_s21, %s646_s21 }
   0xb   :  { %p653_p6 = por %p652_p5, %p651_p4 }
   0xd   :  { %p654_p7 = pnand %p653_p6, %p647_p3 }
   0xf   :  { %657 = shalt.err (!%p654_p7)
}
  0x10   :  { %s685_s22 = smov 256   ;;  %s686_s23 = smov 16  }
  0x11   :  { %21 = dma.hbm_to_vmem [thread:$0]  %s858_s0, 4096, %s16_s13, [#allocation3], %s685_s22, %s685_s22, %s686_s23  }
  0x12   :  { %680 = dma.done.wait [#allocation3], 4096  }
  0x13   :  { %681 = vsyncadd [#allocation3], 4294963200  ;;  %v45_v0 = vld [vmem:[#allocation2 + $0x80] sm:$0xff]  ;;  %v46_v1 = vld [vmem:[#allocation2 + $0x88] sm:$0xff]  ;;  %vm688_vm0 = vmmov 0   ;;  %vm200_vm1 = vcmask 130112  }
  0x14   :  { %v29_v2 = vld [vmem:[#allocation2] sm:$0xff]  ;;  %v133_v3 = vadd.f32 %v46_v1, %v45_v0  ;;  %v30_v4 = vld [vmem:[#allocation2 + $0x8] sm:$0xff]  ;;  %v47_v5 = vld [vmem:[#allocation2 + $0x90] sm:$0xff]  ;;  %v85_v21 = vmax.f32 %v45_v0, %v46_v1  ;;  %vm207_vm2 = vcmask 195712   ;;  %vm214_vm3 = vcmask 261312   ;;  %s690_s15 = smov [#allocation5]  }
  0x15   :  { %v48_v6 = vld [vmem:[#allocation2 + $0x98] sm:$0xff]  ;;  %v109_v7 = vadd.f32 %v30_v4, %v29_v2  ;;  %v31_v8 = vld [vmem:[#allocation2 + $0x10] sm:$0xff]  ;;  %v49_v12 = vld [vmem:[#allocation2 + $0xa0] sm:$0xff]  ;;  %v61_v19 = vmax.f32 %v29_v2, %v30_v4  ;;  %vm221_vm4 = vcmask 326912   ;;  %vm228_vm5 = vcmask 392512   ;;  %s565_s16 = sshll.u32 %s690_s15, 4  ;;  %s566_s16 = int_to_ptr.vmem [resolvable:$true] %s565_s16 }
  0x16   :  { %v32_v9 = vld [vmem:[#allocation2 + $0x18] sm:$0xff]  ;;  %134 = vadd.xlane.f32.xlu1 %v133_v3  ;;  %v136_v10 = vadd.f32 %v48_v6, %v47_v5  ;;  %v50_v13 = vld [vmem:[#allocation2 + $0xa8] sm:$0xff]  ;;  %v33_v14 = vld [vmem:[#allocation2 + $0x20] sm:$0xff]  ;;  %v88_v20 = vmax.f32 %v47_v5, %v48_v6  ;;  %v687_v3 = vmov 0.0|0.0   ;;  %vm235_vm6 = vcmask 458112   ;;  %p663_p9 = scmp.lt.s32.totalorder %s566_s16, %s566_s16 }
  0x17   :  { %110 = vadd.xlane.f32.xlu0 %v109_v7  ;;  %v112_v11 = vadd.f32 %v32_v9, %v31_v8  ;;  %v34_v15 = vld [vmem:[#allocation2 + $0x28] sm:$0xff]  ;;  %v139_v16 = vadd.f32 %v50_v13, %v49_v12  ;;  %v64_v18 = vmax.f32 %v31_v8, %v32_v9  ;;  %v51_v22 = vld [vmem:[#allocation2 + $0xb0] sm:$0xff]  ;;  %v52_v23 = vld [vmem:[#allocation2 + $0xb8] sm:$0xff]  ;;  %v91_v28 = vmax.f32 %v49_v12, %v50_v13 }
  0x18   :  { %v115_v17 = vadd.f32 %v34_v15, %v33_v14  ;;  %v35_v24 = vld [vmem:[#allocation2 + $0x30] sm:$0xff]  ;;  %v36_v25 = vld [vmem:[#allocation2 + $0x38] sm:$0xff]  ;;  %v142_v26 = vadd.f32 %v52_v23, %v51_v22  ;;  %v67_v29 = vmax.f32 %v33_v14, %v34_v15  ;;  %v53_v30 = vld [vmem:[#allocation2 + $0xc0] sm:$0xff]  ;;  %v94_v36 = vmax.f32 %v51_v22, %v52_v23  ;;  %613 = vmatprep.subr.bf16.mxu0 %v687_v3 }
  0x19   :  { %v118_v27 = vadd.f32 %v36_v25, %v35_v24  ;;  %v54_v31 = vld [vmem:[#allocation2 + $0xc8] sm:$0xff]  ;;  %v37_v32 = vld [vmem:[#allocation2 + $0x40] sm:$0xff]  ;;  %v70_v37 = vmax.f32 %v35_v24, %v36_v25  ;;  %v55_v38 = vld [vmem:[#allocation2 + $0xd0] sm:$0xff]  ;;  %v689_v13 = vmov 0.0   ;;  %vm242_vm7 = vcmask 523712  }
  0x1a   :  { %137 = vadd.xlane.f32.xlu1 %v136_v10  ;;  %v38_v33 = vld [vmem:[#allocation2 + $0x48] sm:$0xff]  ;;  %v145_v34 = vadd.f32 %v54_v31, %v53_v30  ;;  %v56_v39 = vld [vmem:[#allocation2 + $0xd8] sm:$0xff]  ;;  %v39_v40 = vld [vmem:[#allocation2 + $0x50] sm:$0xff]  ;;  %v97_v44 = vmax.f32 %v53_v30, %v54_v31  ;;  %605 = vmatprep.mubr.msk.f32.mxu0 %vm688_vm0, %v689_v13  ;;  %v189_v30 = vlaneseq  ;;  %vm283_vm8 = vcmask 1041409  }
  0x1b   :  { %113 = vadd.xlane.f32.xlu0 %v112_v11  ;;  %v121_v35 = vadd.f32 %v38_v33, %v37_v32  ;;  %v40_v41 = vld [vmem:[#allocation2 + $0x58] sm:$0xff]  ;;  %v148_v42 = vadd.f32 %v56_v39, %v55_v38  ;;  %v73_v45 = vmax.f32 %v37_v32, %v38_v33  ;;  %v57_v46 = vld [vmem:[#allocation2 + $0xe0] sm:$0xff]  ;;  %v58_v47 = vld [vmem:[#allocation2 + $0xe8] sm:$0xff]  ;;  %v100_v52 = vmax.f32 %v55_v38, %v56_v39 }
  0x1c   :  { %v124_v43 = vadd.f32 %v40_v41, %v39_v40  ;;  %v41_v48 = vld [vmem:[#allocation2 + $0x60] sm:$0xff]  ;;  %v42_v49 = vld [vmem:[#allocation2 + $0x68] sm:$0xff]  ;;  %v151_v50 = vadd.f32 %v58_v47, %v57_v46  ;;  %v76_v53 = vmax.f32 %v39_v40, %v40_v41  ;;  %v59_v54 = vld [vmem:[#allocation2 + $0xf0] sm:$0xff]  ;;  %v103_v60 = vmax.f32 %v57_v46, %v58_v47  ;;  %608 = vmatprep.subr.mxu1 %v689_v13 }
  0x1d   :  { %v127_v51 = vadd.f32 %v42_v49, %v41_v48  ;;  %v60_v55 = vld [vmem:[#allocation2 + $0xf8] sm:$0xff]  ;;  %v43_v56 = vld [vmem:[#allocation2 + $0x70] sm:$0xff]  ;;  %v79_v61 = vmax.f32 %v41_v48, %v42_v49  ;;  %v385_v0 = vld [vmem:[%s859_s1] sm:$0xff]  ;;  %610 = vmatprep.mubr.msk.f32.mxu1 %vm688_vm0, %v689_v13  ;;  %v190_v33 = vand.u32 127, %v189_v30  ;;  %vm380_vm9 = vcmask 1043459  }
  0x1e   :  { %140 = vadd.xlane.f32.xlu1 %v139_v16  ;;  %v44_v57 = vld [vmem:[#allocation2 + $0x78] sm:$0xff]  ;;  %v154_v58 = vadd.f32 %v60_v55, %v59_v54  ;;  %v106_v62 = vmax.f32 %v59_v54, %v60_v55  ;;  %v386_v1 = vld [vmem:[%s859_s1 + $0x8] sm:$0xff]  ;;  %v387_v4 = vld [vmem:[%s859_s1 + $0x10] sm:$0xff]  ;;  %vm383_vm10 = vcmask 1041408   ;;  %vm393_vm11 = vcmask 523264  }
  0x1f   :  { %116 = vadd.xlane.f32.xlu0 %v115_v17  ;;  %v130_v59 = vadd.f32 %v44_v57, %v43_v56  ;;  %v82_v63 = vmax.f32 %v43_v56, %v44_v57  ;;  %v614_v2 = vpack.c.bf16 %v386_v1, %v385_v0  ;;  %v388_v5 = vld [vmem:[%s859_s1 + $0x18] sm:$0xff]  ;;  %v389_v7 = vld [vmem:[%s859_s1 + $0x20] sm:$0xff]  ;;  %v390_v8 = vld [vmem:[%s859_s1 + $0x28] sm:$0xff]  ;;  %v209_v39 = vadd.s32 4294967272, %v190_v33 }
  0x20   :  { %v617_v6 = vpack.c.bf16 %v388_v5, %v387_v4  ;;  %v620_v9 = vpack.c.bf16 %v390_v8, %v389_v7  ;;  %v391_v10 = vld [vmem:[%s859_s1 + $0x30] sm:$0xff]  ;;  %v392_v11 = vld [vmem:[%s859_s1 + $0x38] sm:$0xff]  ;;  %v223_v48 = vadd.s32 4294967256, %v190_v33  ;;  %v230_v49 = vadd.s32 4294967248, %v190_v33 }
  0x21   :  { %615 = vmatpush3.bf16.msra.mxu0 %v614_v2  ;;  %v623_v12 = vpack.c.bf16 %v392_v11, %v391_v10  ;;  %vm473_vm12 = vcmask 1043456   ;;  %vm469_vm13 = vcmask 31744   ;;  %vm557_vm14 = vcmask 517120  }
  0x22   :  { %65 = vmax.xlane.f32.xlu1 %v64_v18  ;;  %616 = vmatprep.subr.bf16.mxu0 %v687_v3 }
  0x23   :  { %62 = vmax.xlane.f32.xlu0 %v61_v19 }
  0x25   :  { %618 = vmatpush3.bf16.msra.mxu0 %v617_v6 }
  0x26   :  { %89 = vmax.xlane.f32.xlu1 %v88_v20  ;;  %619 = vmatprep.subr.bf16.mxu0 %v687_v3 }
  0x27   :  { %86 = vmax.xlane.f32.xlu0 %v85_v21 }
  0x29   :  { %621 = vmatpush3.bf16.msra.mxu0 %v620_v9 }
  0x2a   :  { %143 = vadd.xlane.f32.xlu1 %v142_v26  ;;  %622 = vmatprep.subr.bf16.mxu0 %v687_v3 }
  0x2b   :  { %119 = vadd.xlane.f32.xlu0 %v118_v27 }
  0x2d   :  { %624 = vmatpush3.bf16.msra.mxu0 %v623_v12 }
  0x2e   :  { %92 = vmax.xlane.f32.xlu1 %v91_v28 }
  0x2f   :  { %68 = vmax.xlane.f32.xlu0 %v67_v29 }
  0x32   :  { %146 = vadd.xlane.f32.xlu1 %v145_v34 }
  0x33   :  { %122 = vadd.xlane.f32.xlu0 %v121_v35  ;;  %v192_v35 = vshrl.u32 %v189_v30, 7 }
  0x35   :  { %v193_v41 = vsub.s32 %v190_v33, %v192_v35  ;;  %v769_v54 = vsub.s32 %v209_v39, %v192_v35  ;;  %v775_v0 = vsub.s32 %v230_v49, %v192_v35 }
  0x36   :  { %95 = vmax.xlane.f32.xlu1 %v94_v36  ;;  %v195_v36 = vadd.s32 4294967288, %v190_v33 }
  0x37   :  { %71 = vmax.xlane.f32.xlu0 %v70_v37  ;;  %v202_v37 = vadd.s32 4294967280, %v190_v33 }
  0x3a   :  { %149 = vadd.xlane.f32.xlu1 %v148_v42  ;;  %v198_v42 = vsub.s32 %v195_v36, %v192_v35 }
  0x3b   :  { %125 = vadd.xlane.f32.xlu0 %v124_v43  ;;  %v765_v43 = vsub.s32 %v202_v37, %v192_v35 }
  0x3e   :  { %98 = vmax.xlane.f32.xlu1 %v97_v44  ;;  %v216_v44 = vadd.s32 4294967264, %v190_v33 }
  0x3f   :  { %74 = vmax.xlane.f32.xlu0 %v73_v45 }
  0x42   :  { %152 = vadd.xlane.f32.xlu1 %v151_v50 }
  0x43   :  { %128 = vadd.xlane.f32.xlu0 %v127_v51 }
  0x46   :  { %101 = vmax.xlane.f32.xlu1 %v100_v52 }
  0x47   :  { %77 = vmax.xlane.f32.xlu0 %v76_v53 }
  0x4a   :  { %155 = vadd.xlane.f32.xlu1 %v154_v58  ;;  %v771_v58 = vsub.s32 %v216_v44, %v192_v35 }
  0x4b   :  { %131 = vadd.xlane.f32.xlu0 %v130_v59 }
  0x4e   :  { %104 = vmax.xlane.f32.xlu1 %v103_v60  ;;  %v237_v60 = vadd.s32 4294967240, %v190_v33 }
  0x4f   :  { %80 = vmax.xlane.f32.xlu0 %v79_v61 }
  0x52   :  { %107 = vmax.xlane.f32.xlu1 %v106_v62 }
  0x53   :  { %83 = vmax.xlane.f32.xlu0 %v82_v63  ;;  %v773_v63 = vsub.s32 %v223_v48, %v192_v35 }
  0xa3   :  { %v135_v14 = vpop.xlane.xlu1 %134 }
  0xa4   :  { %v111_v15 = vpop.xlane.xlu0 %110  ;;  %v165_v50 = vmul.f32 0.00390625, %v135_v14  ;;  %v785_v14 = vsub.s32 %v237_v60, %v192_v35 }
  0xa5   :  { %v157_v51 = vmul.f32 0.00390625, %v111_v15 }
  0xa6   :  { %v344_v1 = vrot.slane %v165_v50, %v193_v41 }
  0xa7   :  { %v138_v16 = vpop.xlane.xlu1 %137  ;;  %v305_v2 = vrot.slane %v157_v51, %v193_v41 }
  0xa8   :  { %v114_v17 = vpop.xlane.xlu0 %113  ;;  %v166_v46 = vmul.f32 0.00390625, %v138_v16 }
  0xa9   :  { %v158_v47 = vmul.f32 0.00390625, %v114_v17 }
  0xaa   :  { %v348_v61 = vrot.slane %v166_v46, %v198_v42 }
  0xab   :  { %v141_v18 = vpop.xlane.xlu1 %140  ;;  %v309_v62 = vrot.slane %v158_v47, %v198_v42 }
  0xac   :  { %v117_v19 = vpop.xlane.xlu0 %116  ;;  %v167_v52 = vmul.f32 0.00390625, %v141_v18  ;;  %v349_v15 = vsel %vm200_vm1, %v348_v61, %v344_v1 }
  0xad   :  { %v159_v53 = vmul.f32 0.00390625, %v117_v19  ;;  %v310_v16 = vsel %vm200_vm1, %v309_v62, %v305_v2 }
  0xae   :  { %v353_v3 = vrot.slane %v167_v52, %v765_v43 }
  0xaf   :  { %v747_v20 = vpop.xlane.xlu1 %65  ;;  %v314_v4 = vrot.slane %v159_v53, %v765_v43 }
  0xb0   :  { %v749_v21 = vpop.xlane.xlu0 %62  ;;  %v199_v5 = vrot.slane %v747_v20, %v198_v42  ;;  %v354_v19 = vsel %vm207_vm2, %v353_v3, %v349_v15 }
  0xb1   :  { %v194_v6 = vrot.slane %v749_v21, %v193_v41  ;;  %v315_v20 = vsel %vm207_vm2, %v314_v4, %v310_v16  ;;  %v468_v16 = vld [vmem:[%s860_s2] sm:$0xf]  ;;  %s658_s2 = scalar_lea.vmem %s566_s16, 32 }
  0xb2   :  { %609 = vmatpush3.msk.msra.mxu1 %vm473_vm12, %v468_v16  ;;  %p659_p8 = scmp.ne.s32.totalorder %s566_s16, %s658_s2  ;;  %p664_p10 = scmp.lt.s32.totalorder %s658_s2, %s658_s2 }
  0xb3   :  { %v751_v22 = vpop.xlane.xlu1 %89 }
  0xb4   :  { %v753_v23 = vpop.xlane.xlu0 %86  ;;  %v251_v7 = vrot.slane %v751_v22, %v198_v42  ;;  %p665_p11 = por %p664_p10, %p663_p9 }
  0xb5   :  { %v247_v8 = vrot.slane %v753_v23, %v193_v41  ;;  %v201_v23 = vsel %vm200_vm1, %v199_v5, %v194_v6 }
  0xb6   :  { %p666_p12 = pnand %p665_p11, %p659_p8 }
  0xb7   :  { %v144_v24 = vpop.xlane.xlu1 %143 }
  0xb8   :  { %v120_v25 = vpop.xlane.xlu0 %119  ;;  %v168_v56 = vmul.f32 0.00390625, %v144_v24  ;;  %v252_v24 = vsel %vm200_vm1, %v251_v7, %v247_v8 }
  0xb9   :  { %v160_v57 = vmul.f32 0.00390625, %v120_v25 }
  0xba   :  { %v358_v10 = vrot.slane %v168_v56, %v769_v54 }
  0xbb   :  { %v755_v26 = vpop.xlane.xlu1 %92  ;;  %v319_v11 = vrot.slane %v160_v57, %v769_v54 }
  0xbc   :  { %v757_v27 = vpop.xlane.xlu0 %68  ;;  %v256_v17 = vrot.slane %v755_v26, %v765_v43  ;;  %v359_v33 = vsel %vm214_vm3, %v358_v10, %v354_v19 }
  0xbd   :  { %v206_v21 = vrot.slane %v757_v27, %v765_v43  ;;  %v320_v26 = vsel %vm214_vm3, %v319_v11, %v315_v20 }
  0xbe   :  { %v257_v37 = vsel %vm207_vm2, %v256_v17, %v252_v24 }
  0xbf   :  { %v147_v28 = vpop.xlane.xlu1 %146 }
  0xc0   :  { %v123_v29 = vpop.xlane.xlu0 %122  ;;  %v169_v12 = vmul.f32 0.00390625, %v147_v28 }
  0xc1   :  { %v161_v18 = vmul.f32 0.00390625, %v123_v29 }
  0xc2   :  { %v363_v29 = vrot.slane %v169_v12, %v771_v58 }
  0xc3   :  { %v759_v31 = vpop.xlane.xlu1 %95  ;;  %v324_v27 = vrot.slane %v161_v18, %v771_v58 }
  0xc4   :  { %v761_v32 = vpop.xlane.xlu0 %71  ;;  %v261_v41 = vrot.slane %v759_v31, %v769_v54  ;;  %v364_v50 = vsel %vm221_vm4, %v363_v29, %v359_v33 }
  0xc5   :  { %v213_v42 = vrot.slane %v761_v32, %v769_v54  ;;  %v325_v53 = vsel %vm221_vm4, %v324_v27, %v320_v26 }
  0xc7   :  { %v150_v34 = vpop.xlane.xlu1 %149 }
  0xc8   :  { %v126_v38 = vpop.xlane.xlu0 %125  ;;  %v170_v22 = vmul.f32 0.00390625, %v150_v34 }
  0xc9   :  { %v162_v25 = vmul.f32 0.00390625, %v126_v38  ;;  %v208_v38 = vsel %vm207_vm2, %v206_v21, %v201_v23 }
  0xca   :  { %v368_v43 = vrot.slane %v170_v22, %v773_v63  ;;  %v215_v56 = vsel %vm214_vm3, %v213_v42, %v208_v38 }
  0xcb   :  { %v763_v40 = vpop.xlane.xlu1 %98  ;;  %v329_v44 = vrot.slane %v162_v25, %v773_v63 }
  0xcc   :  { %v767_v45 = vpop.xlane.xlu0 %74  ;;  %v266_v46 = vrot.slane %v763_v40, %v771_v58  ;;  %v369_v57 = vsel %vm228_vm5, %v368_v43, %v364_v50 }
  0xcd   :  { %v220_v47 = vrot.slane %v767_v45, %v771_v58 }
  0xcf   :  { %v153_v55 = vpop.xlane.xlu1 %152  ;;  %v222_v61 = vsel %vm221_vm4, %v220_v47, %v215_v56 }
  0xd0   :  { %v129_v59 = vpop.xlane.xlu0 %128  ;;  %v171_v28 = vmul.f32 0.00390625, %v153_v55  ;;  %v262_v55 = vsel %vm214_vm3, %v261_v41, %v257_v37 }
  0xd1   :  { %v163_v35 = vmul.f32 0.00390625, %v129_v59  ;;  %v330_v59 = vsel %vm228_vm5, %v329_v44, %v325_v53  ;;  %v267_v60 = vsel %vm221_vm4, %v266_v46, %v262_v55 }
  0xd2   :  { %v373_v48 = vrot.slane %v171_v28, %v775_v0 }
  0xd3   :  { %v102_v9 = vpop.xlane.xlu1 %101  ;;  %v334_v31 = vrot.slane %v163_v35, %v775_v0 }
  0xd4   :  { %v78_v13 = vpop.xlane.xlu0 %77  ;;  %v271_v51 = vrot.slane %v102_v9, %v773_v63  ;;  %v374_v62 = vsel %vm235_vm6, %v373_v48, %v369_v57 }
  0xd5   :  { %v227_v32 = vrot.slane %v78_v13, %v773_v63  ;;  %v335_v1 = vsel %vm235_vm6, %v334_v31, %v330_v59 }
  0xd6   :  { %v272_v2 = vsel %vm228_vm5, %v271_v51, %v267_v60 }
  0xd7   :  { %v156_v30 = vpop.xlane.xlu1 %155  ;;  %v229_v3 = vsel %vm228_vm5, %v227_v32, %v222_v61 }
  0xd8   :  { %v132_v36 = vpop.xlane.xlu0 %131  ;;  %v172_v34 = vmul.f32 0.00390625, %v156_v30 }
  0xd9   :  { %v164_v39 = vmul.f32 0.00390625, %v132_v36 }
  0xda   :  { %v378_v54 = vrot.slane %v172_v34, %v785_v14 }
  0xdb   :  { %v105_v49 = vpop.xlane.xlu1 %104  ;;  %v339_v40 = vrot.slane %v164_v39, %v785_v14 }
  0xdc   :  { %v81_v52 = vpop.xlane.xlu0 %80  ;;  %v276_v45 = vrot.slane %v105_v49, %v775_v0 }
  0xdd   :  { %v234_v58 = vrot.slane %v81_v52, %v775_v0  ;;  %v379_v0 = vsel %vm242_vm7, %v378_v54, %v374_v62  ;;  %v340_v6 = vsel %vm242_vm7, %v339_v40, %v335_v1 }
  0xde   :  { %v277_v7 = vsel %vm235_vm6, %v276_v45, %v272_v2  ;;  %v381_v13 = vsel %vm380_vm9, %v379_v0, %v340_v6 }
  0xdf   :  { %v108_v63 = vpop.xlane.xlu1 %107  ;;  %v236_v9 = vsel %vm235_vm6, %v234_v58, %v229_v3 }
  0xe0   :  { %v281_v4 = vrot.slane %v108_v63, %v785_v14  ;;  %v84_v5 = vpop.xlane.xlu0 %83 }
  0xe1   :  { %v241_v8 = vrot.slane %v84_v5, %v785_v14 }
  0xe2   :  { %v282_v10 = vsel %vm242_vm7, %v281_v4, %v277_v7 }
  0xe3   :  { %v243_v11 = vsel %vm242_vm7, %v241_v8, %v236_v9 }
  0xe4   :  { %v284_v12 = vsel %vm283_vm8, %v282_v10, %v243_v11 }
  0xe5   :  { %v384_v15 = vsel %vm383_vm10, %v284_v12, %v381_v13 }
  0xe6   :  { %606 = vmatmul.mubr.msk.f32.vlgmr.msra.gmra.mrb[0].mxu0 %vm393_vm11, %v384_v15 }
 0x1b9   :  { %v463_v14 = vpop.f32.mrb[0].mxu0 }
 0x1ba   :  { %v467_v17 = vmax.f32 %v463_v14, 0.0  ;;  %v607_v18 = vpop.f32.mrb[1].mxu0 }
 0x1bc   :  { %611 = vmatmul.mubr.msk.f32.vlgmr.msra.gmra.mrb[0].mxu1 %vm469_vm13, %v467_v17 }
 0x28f   :  { %v543_v19 = vpop.f32.mrb[0].mxu1 }
 0x290   :  { %v548_v20 = vrot.slane %v543_v19, 2  ;;  %v612_v21 = vpop.f32.mrb[1].mxu1 }
 0x292   :  { %v550_v22 = vadd.f32 %v548_v20, %v543_v19 }
 0x294   :  { %v577_v23 = vmul.f32 -1.442695, %v550_v22 }
 0x296   :  { %632 = vpow2.f32 %v577_v23 }
 0x2a0   :  { %v633_v24 = vpop.eup %632 }
 0x2a1   :  { %v554_v25 = vadd.f32 1.0, %v633_v24 }
 0x2a3   :  { %634 = vrcp.f32 %v554_v25 }
 0x2ad   :  { %v635_v28 = vpop.eup %634 }
 0x2ae   :  { %558 = vst.msk [vmem:[#allocation5] sm:$0x3] %vm557_vm14, %v635_v28 }
 0x2af   :  { %669 = shalt.err (!%p666_p12)
}
 0x2b0   :  { %s670_s19 = scalar_lea.hbm %s861_s3, 32 }
 0x2b1   :  { %p671_p13 = scmp.ne.s32.totalorder %s861_s3, %s670_s19  ;;  %p674_p0 = scmp.lt.u32.totalorder %s670_s19, %s861_s3 }
 0x2b3   :  { %p676_p1 = pnand %p674_p0, %p671_p13 }
 0x2b5   :  { %679 = shalt.err (!%p676_p1)
}
 0x2b6   :  { %568 = dma.vmem_to_hbm [thread:$0]  %s566_s16, 32, %s861_s3, [#allocation4]  }
 0x2b7   :  { %682 = dma.done.wait [#allocation4], 32  }
 0x2b8   :  { %683 = vsyncadd [#allocation4], 4294967264 }
 0x2b9   :  { %572 = vsyncpa [#allocation3], 1 }
 0x2ba   :  { %573 = vsyncpa [#allocation4], 1 }

</bundles_post_ra>
